<compile_context>
chip_gen: v7x
topology: tpu7x:2x2x1
jax: 0.10.0
libtpu: 0.0.40
codegen_flags: <defaults>
</compile_context>

<pallas_src>
import functools

import jax
import jax.numpy as jnp
from jax.experimental import pallas as pl
from jax.experimental.pallas import tpu as pltpu


def _round_up(x: int, m: int) -> int:
    return ((x + m - 1) // m) * m


def _cdiv(a: int, b: int) -> int:
    return (a + b - 1) // b


def _vmem_capacity_bytes() -> int:
    """Generation-aware VMEM capacity (falls back to the v7x per-TC minimum)."""
    try:
        cap = getattr(pltpu.get_tpu_info(), "vmem_capacity_bytes", None)
        if cap:
            return int(cap)
    except Exception:
        pass
    return 64 << 20


def speaker_encoder_kernel(x_ref, we_ref, be_ref, wd_ref, bd_ref, out_ref,
                           acc_ref, *, k_tile, k_total):
    """Fused __E__ (ReLU(x @ W_enc + b_enc)) + __D__ (emb @ W_dec + b_dec).

    Grid = (N tiles ["parallel"], K tiles ["arbitrary"]):
      x:   (TILE_N, TILE_K)  f32 raw-waveform tile (bf16 cast in-body)
      we:  (TILE_K, D)       bf16 encoder weight tile      be: (1, D)     f32
      wd:  (D, C_pad)        bf16 classifier weight        bd: (1, C_pad) f32
      out: (TILE_N, C_pad)   f32 logits
      acc: (TILE_N, D)       f32 running (b_enc + x @ W_enc) accumulator
    """
    k = pl.program_id(1)

    @pl.when(k == 0)
    def _():
        # Seed the accumulator with the encoder bias (saves an epilogue add).
        acc_ref[...] = jnp.broadcast_to(be_ref[...], acc_ref.shape)

    x = x_ref[...]
    w = we_ref[...]
    if k_total % k_tile != 0:
        # The last K tile overruns T: the OOB region of the block holds garbage
        # (possibly NaN bit patterns), so zero BOTH operands past T before the
        # MXU.  Cheap VPU selects; all-true masks on the non-tail tiles.
        x_cols = k * k_tile + jax.lax.broadcasted_iota(jnp.int32, x.shape, 1)
        w_rows = k * k_tile + jax.lax.broadcasted_iota(jnp.int32, w.shape, 0)
        x = jnp.where(x_cols < k_total, x, jnp.zeros_like(x))
        w = jnp.where(w_rows < k_total, w, jnp.zeros_like(w))

    # __E__ matmul: bf16 operands on the MXU, f32 accumulation.
    acc_ref[...] += jnp.dot(x.astype(jnp.bfloat16), w,
                            preferred_element_type=jnp.float32)

    @pl.when(k == pl.num_programs(1) - 1)
    def _():
        emb = jnp.maximum(acc_ref[...], 0.0)                        # ReLU (VPU)
        logits = jnp.dot(emb.astype(wd_ref.dtype), wd_ref[...],     # __D__ (MXU)
                         preferred_element_type=jnp.float32)
        out_ref[...] = (logits + bd_ref[...]).astype(out_ref.dtype)


def prepare_speaker_encoder_params(w_enc, b_enc, w_dec, b_dec):
    """One-time parameter preprocessing, hoisted out of the per-call forward.

    * Encoder weight: bf16; K (waveform) and nOut (D) dims left un-padded.
    * Classifier weight/bias: C padded once to a lane multiple (128) so the
      kernel's output store path is unmasked / lane-dense.
    """
    T, D = w_enc.shape
    Dd, C = w_dec.shape
    assert Dd == D, (Dd, D)
    C_pad = _round_up(C, 128)
    we = jnp.asarray(w_enc, jnp.bfloat16)                              # (T, D)
    be = jnp.asarray(b_enc, jnp.float32).reshape(1, D)                 # (1, D)
    wd = jnp.pad(jnp.asarray(w_dec, jnp.float32), ((0, 0), (0, C_pad - C)))
    bd = jnp.pad(jnp.asarray(b_dec, jnp.float32).reshape(1, C),
                 ((0, 0), (0, C_pad - C)))
    return {"w_enc": we, "b_enc": be,
            "w_dec": wd.astype(jnp.bfloat16), "b_dec": bd}


def speaker_encoder_forward(data, params, out_neurons, *, tile_n=512, tile_k=2048):
    """Mirrors SpeakerEncoder.forward(data, label=None) for features='raw'.

    data: (..., T) raw waveform.  Returns (prod(leading dims), out_neurons) f32.
    """
    T = data.shape[-1]
    x = data.reshape(-1, T).astype(jnp.float32)        # (N, T), streamed as-is
    N = x.shape[0]

    w_enc, b_enc = params["w_enc"], params["b_enc"]
    w_dec, b_dec = params["w_dec"], params["b_dec"]
    D = w_enc.shape[1]
    C_pad = w_dec.shape[1]
    C = int(out_neurons)

    # --- balanced N tiling; keep >=2 "parallel" blocks when N allows (v7x) ---
    n_blocks = max(_cdiv(N, tile_n), 1)
    if n_blocks == 1 and N > 8:
        n_blocks = 2
    TILE_N = _round_up(_cdiv(N, n_blocks), 8)
    grid_n = _cdiv(N, TILE_N)
    N_pad = grid_n * TILE_N                            # padded OUTPUT rows only

    # --- K (waveform) tiling: big tiles amortize per-step pipeline overhead --
    TILE_K = min(_round_up(T, 128), tile_k)
    grid_k = _cdiv(T, TILE_K)

    grid = (grid_n, grid_k)

    # --- generation-aware VMEM budget ----------------------------------------
    vmem_bytes = (2 * TILE_N * TILE_K * 4      # x tiles (f32, double-buffered)
                  + 2 * TILE_K * D * 2         # w_enc tiles (bf16)
                  + 2 * D * C_pad * 2          # w_dec (bf16)
                  + 2 * (D + C_pad) * 4        # biases (f32)
                  + 2 * TILE_N * C_pad * 4     # out tiles (f32)
                  + TILE_N * D * 4)            # accumulator (f32)
    vmem_limit = int(min(max(2 * vmem_bytes, 16 << 20),
                         (_vmem_capacity_bytes() * 3) // 4))

    cost = pl.CostEstimate(
        flops=2 * N * T * D + 2 * N * D * C_pad,
        transcendentals=0,
        bytes_accessed=(N * T * 4              # x (f32), streamed once
                        + grid_n * T * D * 2   # w_enc re-streamed per N tile
                        + D * C_pad * 2 + (D + C_pad) * 4
                        + N_pad * C_pad * 4),  # logits (f32)
    )

    kernel = functools.partial(speaker_encoder_kernel, k_tile=TILE_K, k_total=T)

    out = pl.pallas_call(
        kernel,
        out_shape=jax.ShapeDtypeStruct((N_pad, C_pad), jnp.float32),
        grid_spec=pltpu.PrefetchScalarGridSpec(
            num_scalar_prefetch=0,
            grid=grid,
            in_specs=[
                pl.BlockSpec((TILE_N, TILE_K), lambda i, k: (i, k)),   # x
                pl.BlockSpec((TILE_K, D), lambda i, k: (k, 0)),        # w_enc
                pl.BlockSpec((1, D), lambda i, k: (0, 0)),             # b_enc
                pl.BlockSpec((D, C_pad), lambda i, k: (0, 0)),         # w_dec
                pl.BlockSpec((1, C_pad), lambda i, k: (0, 0)),         # b_dec
            ],
            out_specs=pl.BlockSpec((TILE_N, C_pad), lambda i, k: (i, 0)),
            scratch_shapes=[pltpu.VMEM((TILE_N, D), jnp.float32)],
        ),
        compiler_params=pltpu.CompilerParams(
            dimension_semantics=("parallel", "arbitrary"),
            vmem_limit_bytes=vmem_limit,
        ),
        cost_estimate=cost,
    )(x, w_enc, b_enc, w_dec, b_dec)

    # torch.stack(..., dim=1).squeeze() -> (N, out_neurons); strip padding.
    return out[:N, :C]


if __name__ == "__main__":
    # Small, deterministic synthetic configuration.
    batch = 2
    nPerSpeaker = 2
    T = 64            # raw waveform length per utterance segment
    nOut = 32         # embedding size (model['nOut'])
    out_neurons = 16  # classifier['out_neurons']

    key = jax.random.PRNGKey(0)
    k_data, k_we, k_be, k_wd, k_bd = jax.random.split(key, 5)

    data = jax.random.normal(k_data, (batch, nPerSpeaker, T), dtype=jnp.float32)
    w_enc = jax.random.normal(k_we, (T, nOut), dtype=jnp.float32) * 0.1
    b_enc = jax.random.normal(k_be, (1, nOut), dtype=jnp.float32) * 0.01
    w_dec = jax.random.normal(k_wd, (nOut, out_neurons), dtype=jnp.float32) * 0.1
    b_dec = jax.random.normal(k_bd, (1, out_neurons), dtype=jnp.float32) * 0.01

    # Parameter prep runs ONCE (hoisted out of the per-call forward path).
    params = prepare_speaker_encoder_params(w_enc, b_enc, w_dec, b_dec)

    fwd = jax.jit(speaker_encoder_forward, static_argnums=(2,))
    output_cls = jax.block_until_ready(fwd(data, params, out_neurons))

    # Reference mirroring the kernel's precision (bf16 operands, f32 accum).
    x = data.reshape(-1, T)
    emb_ref = jnp.dot(x.astype(jnp.bfloat16), w_enc.astype(jnp.bfloat16),
                      preferred_element_type=jnp.float32) + b_enc
    emb_ref = jnp.maximum(emb_ref, 0.0)
    ref = jnp.dot(emb_ref.astype(jnp.bfloat16), w_dec.astype(jnp.bfloat16),
                  preferred_element_type=jnp.float32) + b_dec

    # Full-precision sanity reference (loose tolerance for bf16 operands).
    ref_f32 = jnp.maximum(x @ w_enc + b_enc, 0.0) @ w_dec + b_dec

    assert output_cls.shape == (batch * nPerSpeaker, out_neurons), output_cls.shape
    assert jnp.allclose(output_cls, ref, atol=1e-2, rtol=1e-2), \
        float(jnp.max(jnp.abs(output_cls - ref)))
    assert jnp.allclose(output_cls, ref_f32, atol=5e-2, rtol=5e-2), \
        float(jnp.max(jnp.abs(output_cls - ref_f32)))

    print("KERNEL_OK")
</pallas_src>

<mosaic_0001>
module attributes {stable_mosaic.version = 11 : i64} {
  func.func @speaker_encoder_kernel(%arg0: i32, %arg1: i32, %arg2: memref<8x128xf32, #tpu.memory_space<vmem>>, %arg3: memref<128x32xbf16, #tpu.memory_space<vmem>>, %arg4: memref<1x32xf32, #tpu.memory_space<vmem>>, %arg5: memref<32x128xbf16, #tpu.memory_space<vmem>>, %arg6: memref<1x128xf32, #tpu.memory_space<vmem>>, %arg7: memref<8x128xf32, #tpu.memory_space<vmem>>, %arg8: memref<8x32xf32, #tpu.memory_space<vmem>>) attributes {dimension_semantics = [#tpu.dimension_semantics<parallel>, #tpu.dimension_semantics<arbitrary>], iteration_bounds = array<i64: 1, 1>, scalar_prefetch = 0 : i64, scratch_operands = 1 : i64, tpu.core_type = #tpu.core_type<tc>, window_params = [{transform_indices = @transform_0, window_bounds = array<i64: 8, 128>}, {transform_indices = @transform_1, window_bounds = array<i64: 128, 32>}, {pipeline_mode = #tpu.pipeline_mode<synchronous>, transform_indices = @transform_2, window_bounds = array<i64: 1, 32>}, {pipeline_mode = #tpu.pipeline_mode<synchronous>, transform_indices = @transform_3, window_bounds = array<i64: 32, 128>}, {pipeline_mode = #tpu.pipeline_mode<synchronous>, transform_indices = @transform_4, window_bounds = array<i64: 1, 128>}, {transform_indices = @transform_5, window_bounds = array<i64: 8, 128>}]} {
    %c0_i32 = arith.constant 0 : i32
    %0 = arith.cmpi eq, %arg1, %c0_i32 : i32
    %1 = arith.extui %0 : i1 to i32
    %c0_i32_0 = arith.constant 0 : i32
    %2 = arith.cmpi ne, %1, %c0_i32_0 : i32
    scf.if %2 {
      %c0_14 = arith.constant 0 : index
      %c0_15 = arith.constant 0 : index
      %29 = vector.load %arg4[%c0_14, %c0_15] : memref<1x32xf32, #tpu.memory_space<vmem>>, vector<1x32xf32>
      %30 = vector.shape_cast %29 : vector<1x32xf32> to vector<1x32xf32>
      %31 = vector.broadcast %30 : vector<1x32xf32> to vector<8x32xf32>
      %c0_16 = arith.constant 0 : index
      %c0_17 = arith.constant 0 : index
      %32 = vector.load %arg8[%c0_16, %c0_17] : memref<8x32xf32, #tpu.memory_space<vmem>>, vector<8x32xf32>
      tpu.vector_store %arg8[%c0_16, %c0_17], %31 {strides = array<i32>} : memref<8x32xf32, #tpu.memory_space<vmem>>, vector<8x32xf32>,
    } else {
    }
    %c0 = arith.constant 0 : index
    %c0_1 = arith.constant 0 : index
    %3 = vector.load %arg2[%c0, %c0_1] : memref<8x128xf32, #tpu.memory_space<vmem>>, vector<8x128xf32>
    %c0_2 = arith.constant 0 : index
    %c0_3 = arith.constant 0 : index
    %4 = vector.load %arg3[%c0_2, %c0_3] : memref<128x32xbf16, #tpu.memory_space<vmem>>, vector<128x32xbf16>
    %c128_i32 = arith.constant 128 : i32
    %5 = arith.muli %arg1, %c128_i32 : i32
    %6 = tpu.iota {dimensions = array<i32: 1>} : vector<8x128xi32>
    %7 = vector.broadcast %5 : i32 to vector<8x128xi32>
    %8 = arith.addi %7, %6 : vector<8x128xi32>
    %c128_i32_4 = arith.constant 128 : i32
    %9 = arith.muli %arg1, %c128_i32_4 : i32
    %10 = tpu.iota {dimensions = array<i32: 0>} : vector<128x32xi32>
    %11 = vector.broadcast %9 : i32 to vector<128x32xi32>
    %12 = arith.addi %11, %10 : vector<128x32xi32>
    %c64_i32 = arith.constant 64 : i32
    %13 = vector.broadcast %c64_i32 : i32 to vector<8x128xi32>
    %14 = arith.cmpi slt, %8, %13 : vector<8x128xi32>
    %cst = arith.constant 0.000000e+00 : f32
    %15 = vector.broadcast %cst : f32 to vector<8x128xf32>
    %16 = arith.select %14, %3, %15 : vector<8x128xi1>, vector<8x128xf32>
    %c64_i32_5 = arith.constant 64 : i32
    %17 = vector.broadcast %c64_i32_5 : i32 to vector<128x32xi32>
    %18 = arith.cmpi slt, %12, %17 : vector<128x32xi32>
    %cst_6 = arith.constant 0.000000e+00 : bf16
    %19 = vector.broadcast %cst_6 : bf16 to vector<128x32xbf16>
    %20 = arith.select %18, %4, %19 : vector<128x32xi1>, vector<128x32xbf16>
    %c0_7 = arith.constant 0 : index
    %c0_8 = arith.constant 0 : index
    %21 = vector.load %arg8[%c0_7, %c0_8] : memref<8x32xf32, #tpu.memory_space<vmem>>, vector<8x32xf32>
    %22 = arith.truncf %16 : vector<8x128xf32> to vector<8x128xbf16>
    %cst_9 = arith.constant dense<0.000000e+00> : vector<8x32xf32>
    %23 = tpu.matmul %22, %20, %cst_9 {dimension_numbers = #tpu.dot_dimension_numbers<[1], [0], [0], [1], [0, 0, 1, 1], [], []>} : vector<8x128xbf16>, vector<128x32xbf16>, vector<8x32xf32> -> vector<8x32xf32>
    %24 = arith.addf %21, %23 : vector<8x32xf32>
    %c0_10 = arith.constant 0 : index
    %c0_11 = arith.constant 0 : index
    %25 = vector.load %arg8[%c0_10, %c0_11] : memref<8x32xf32, #tpu.memory_space<vmem>>, vector<8x32xf32>
    tpu.vector_store %arg8[%c0_10, %c0_11], %24 {strides = array<i32>} : memref<8x32xf32, #tpu.memory_space<vmem>>, vector<8x32xf32>,
    %c0_i32_12 = arith.constant 0 : i32
    %26 = arith.cmpi eq, %arg1, %c0_i32_12 : i32
    %27 = arith.extui %26 : i1 to i32
    %c0_i32_13 = arith.constant 0 : i32
    %28 = arith.cmpi ne, %27, %c0_i32_13 : i32
    scf.if %28 {
      %c0_14 = arith.constant 0 : index
      %c0_15 = arith.constant 0 : index
      %29 = vector.load %arg8[%c0_14, %c0_15] : memref<8x32xf32, #tpu.memory_space<vmem>>, vector<8x32xf32>
      %cst_16 = arith.constant 0.000000e+00 : f32
      %30 = vector.broadcast %cst_16 : f32 to vector<8x32xf32>
      %31 = arith.maximumf %29, %30 : vector<8x32xf32>
      %32 = arith.truncf %31 : vector<8x32xf32> to vector<8x32xbf16>
      %c0_17 = arith.constant 0 : index
      %c0_18 = arith.constant 0 : index
      %33 = vector.load %arg5[%c0_17, %c0_18] : memref<32x128xbf16, #tpu.memory_space<vmem>>, vector<32x128xbf16>
      %cst_19 = arith.constant dense<0.000000e+00> : vector<8x128xf32>
      %34 = tpu.matmul %32, %33, %cst_19 {dimension_numbers = #tpu.dot_dimension_numbers<[1], [0], [0], [1], [0, 0, 1, 1], [], []>} : vector<8x32xbf16>, vector<32x128xbf16>, vector<8x128xf32> -> vector<8x128xf32>
      %c0_20 = arith.constant 0 : index
      %c0_21 = arith.constant 0 : index
      %35 = vector.load %arg6[%c0_20, %c0_21] : memref<1x128xf32, #tpu.memory_space<vmem>>, vector<1x128xf32>
      %36 = vector.broadcast %35 : vector<1x128xf32> to vector<8x128xf32>
      %37 = arith.addf %34, %36 : vector<8x128xf32>
      %c0_22 = arith.constant 0 : index
      %c0_23 = arith.constant 0 : index
      %38 = vector.load %arg7[%c0_22, %c0_23] : memref<8x128xf32, #tpu.memory_space<vmem>>, vector<8x128xf32>
      tpu.vector_store %arg7[%c0_22, %c0_23], %37 {strides = array<i32>} : memref<8x128xf32, #tpu.memory_space<vmem>>, vector<8x128xf32>,
    } else {
    }
    return
  }
  func.func @transform_0(%arg0: i32, %arg1: i32) -> (i32, i32) {
    %c0_i32 = arith.constant 0 : i32
    return %arg0, %arg1 : i32, i32
  }
  func.func @transform_1(%arg0: i32, %arg1: i32) -> (i32, i32) {
    %c0_i32 = arith.constant 0 : i32
    %c0_i32_0 = arith.constant 0 : i32
    return %arg1, %c0_i32 : i32, i32
  }
  func.func @transform_2(%arg0: i32, %arg1: i32) -> (i32, i32) {
    %c0_i32 = arith.constant 0 : i32
    %c0_i32_0 = arith.constant 0 : i32
    %c0_i32_1 = arith.constant 0 : i32
    return %c0_i32, %c0_i32_0 : i32, i32
  }
  func.func @transform_3(%arg0: i32, %arg1: i32) -> (i32, i32) {
    %c0_i32 = arith.constant 0 : i32
    %c0_i32_0 = arith.constant 0 : i32
    %c0_i32_1 = arith.constant 0 : i32
    return %c0_i32, %c0_i32_0 : i32, i32
  }
  func.func @transform_4(%arg0: i32, %arg1: i32) -> (i32, i32) {
    %c0_i32 = arith.constant 0 : i32
    %c0_i32_0 = arith.constant 0 : i32
    %c0_i32_1 = arith.constant 0 : i32
    return %c0_i32, %c0_i32_0 : i32, i32
  }
  func.func @transform_5(%arg0: i32, %arg1: i32) -> (i32, i32) {
    %c0_i32 = arith.constant 0 : i32
    %c0_i32_0 = arith.constant 0 : i32
    return %arg0, %c0_i32 : i32, i32
  }
}

</mosaic_0001>

<bundles_post_ra>
// kernel: speaker_encoder_forward.1
= control target key start
LH: loop header
LB: loop body
LE: loop exit
PB: predicated region body
PF: predicated region fallthrough
CT: control target
= control target key end

     0   :  { %v370_v0 = vmov 0.0   ;;  %vm371_vm0 = vmmov 1   ;;  %vm372_vm2 = vmmov 0   ;;  %vm32_vm3 = vcmask 261120   ;;  %s528_s1 = inlined_call_operand.vmem [shape: bf16[64,32], index: 1, kind: input, shape index: {}]   ;;  %s529_s2 = inlined_call_operand.vmem [shape: f32[1,32], index: 2, kind: input, shape index: {}]   ;;  %s530_s0 = inlined_call_operand.vmem [shape: f32[4,64], index: 0, kind: input, shape index: {}]   ;;  %s531_s3 = inlined_call_operand.vmem [shape: bf16[32,128], index: 3, kind: input, shape index: {}]   ;;  %s532_s4 = inlined_call_operand.vmem [shape: f32[1,128], index: 4, kind: input, shape index: {}]   ;;  %s533_s5 = inlined_call_operand.vmem [shape: f32[8,128], index: 5, kind: output, shape index: {}]  }
   0x1   :  { %337 = vmatprep.subr.bf16.mxu0 %v370_v0  ;;  %v35_v1 = vld [vmem:[%s528_s1] sm:$0xf]  ;;  %v36_v2 = vld [vmem:[%s528_s1 + $0x4] sm:$0xf]  ;;  %vm410_vm1 = vmpackc.low %vm371_vm0, %vm371_vm0  ;;  %353 = vmatprep.mubr.msk.bf16.mxu0 %vm372_vm2, %v370_v0  ;;  %v52_v38 = vlaneseq }
   0x2   :  { %v123_v4 = vsel %vm410_vm1, %v35_v1, 0  ;;  %v124_v5 = vsel %vm410_vm1, %v36_v2, 0  ;;  %v37_v6 = vld [vmem:[%s528_s1 + $0x8] sm:$0xf]  ;;  %v38_v7 = vld [vmem:[%s528_s1 + $0xc] sm:$0xf]  ;;  %357 = vmatprep.subr.bf16.mxu1 %v370_v0  ;;  %361 = vmatprep.mubr.msk.bf16.mxu1 %vm372_vm2, %v370_v0  ;;  %vm467_vm4 = vmpackc.low %vm372_vm2, %vm372_vm2 }
   0x3   :  { %v310_v8 = vcombine.low %v123_v4, %v124_v5  ;;  %v125_v9 = vsel %vm410_vm1, %v37_v6, 0  ;;  %v126_v10 = vsel %vm410_vm1, %v38_v7, 0  ;;  %v39_v11 = vld [vmem:[%s528_s1 + $0x10] sm:$0xf]  ;;  %v40_v12 = vld [vmem:[%s528_s1 + $0x14] sm:$0xf] }
   0x4   :  { %v311_v13 = vcombine.low %v125_v9, %v126_v10  ;;  %v127_v14 = vsel %vm410_vm1, %v39_v11, 0  ;;  %v128_v15 = vsel %vm410_vm1, %v40_v12, 0  ;;  %v41_v16 = vld [vmem:[%s528_s1 + $0x18] sm:$0xf]  ;;  %v42_v17 = vld [vmem:[%s528_s1 + $0x1c] sm:$0xf] }
   0x5   :  { %338 = vmatpush3.bf16.msra.mxu0 %v310_v8  ;;  %v312_v18 = vcombine.low %v127_v14, %v128_v15  ;;  %v309_v19 = vld [vmem:[%s529_s2] ss:$0 sm:$0xff]  ;;  %v129_v20 = vsel %vm410_vm1, %v41_v16, 0  ;;  %v130_v21 = vsel %vm410_vm1, %v42_v17, 0  ;;  %v44_v23 = vld [vmem:[%s528_s1 + $0x24] sm:$0xf] }
   0x6   :  { %339 = vmatprep.subr.bf16.mxu0 %v370_v0  ;;  %33 = vst.msk [vmem:[#allocation2] sm:$0xff] %vm32_vm3, %v309_v19  ;;  %v43_v22 = vld [vmem:[%s528_s1 + $0x20] sm:$0xf]  ;;  %v313_v25 = vcombine.low %v129_v20, %v130_v21  ;;  %v132_v27 = vsel %vm467_vm4, %v44_v23, 0  ;;  %v45_v28 = vld [vmem:[%s528_s1 + $0x28] sm:$0xf] }
   0x7   :  { %v131_v26 = vsel %vm467_vm4, %v43_v22, 0  ;;  %v46_v29 = vld [vmem:[%s528_s1 + $0x2c] sm:$0xf]  ;;  %v133_v31 = vsel %vm467_vm4, %v45_v28, 0  ;;  %v47_v33 = vld [vmem:[%s528_s1 + $0x30] sm:$0xf] }
   0x8   :  { %v314_v30 = vcombine.low %v131_v26, %v132_v27  ;;  %v134_v32 = vsel %vm467_vm4, %v46_v29, 0  ;;  %v48_v34 = vld [vmem:[%s528_s1 + $0x34] sm:$0xf]  ;;  %v135_v36 = vsel %vm467_vm4, %v47_v33, 0  ;;  %v49_v39 = vld [vmem:[%s528_s1 + $0x38] sm:$0xf] }
   0x9   :  { %340 = vmatpush3.bf16.msra.mxu0 %v311_v13  ;;  %v315_v35 = vcombine.low %v133_v31, %v134_v32  ;;  %v136_v37 = vsel %vm467_vm4, %v48_v34, 0  ;;  %v50_v40 = vld [vmem:[%s528_s1 + $0x3c] sm:$0xf]  ;;  %v137_v42 = vsel %vm467_vm4, %v49_v39, 0  ;;  %v53_v44 = vand.u32 127, %v52_v38  ;;  %v34_v46 = vld [vmem:[%s530_s0] sm:$0xff] }
   0xa   :  { %341 = vmatprep.subr.bf16.mxu0 %v370_v0  ;;  %v316_v41 = vcombine.low %v135_v36, %v136_v37  ;;  %v138_v43 = vsel %vm467_vm4, %v50_v40, 0  ;;  %v319_v47 = vpack.c.bf16 %v34_v46, %v34_v46  ;;  %v368_v48 = vld [vmem:[%s531_s3] sm:$0xff]   ;;  %v369_v49 = vld [vmem:[%s531_s3 + $0x8] sm:$0xff]  }
   0xb   :  { %v317_v45 = vcombine.low %v137_v42, %v138_v43  ;;  %vm89_vm5 = vcmp.lt.s32.totalorder %v53_v44, 64  ;;  %358 = vmatpush3.bf16.msra.mxu1 %v368_v48  ;;  %v321_v59 = vld [vmem:[%s532_s4] ss:$0 sm:$0xff] }
   0xc   :  { %vm318_vm6 = vmpackc.low %vm89_vm5, %vm89_vm5  ;;  %359 = vmatprep.subr.bf16.mxu1 %v370_v0 }
   0xd   :  { %342 = vmatpush3.bf16.msra.mxu0 %v312_v18  ;;  %v139_v50 = vld [vmem:[#allocation2] sm:$0xff] }
   0xe   :  { %343 = vmatprep.subr.bf16.mxu0 %v370_v0 }
   0xf   :  { %360 = vmatpush3.bf16.msra.mxu1 %v369_v49 }
  0x11   :  { %344 = vmatpush3.bf16.msra.mxu0 %v313_v25 }
  0x12   :  { %345 = vmatprep.subr.bf16.mxu0 %v370_v0 }
  0x15   :  { %346 = vmatpush3.bf16.msra.mxu0 %v314_v30 }
  0x16   :  { %347 = vmatprep.subr.bf16.mxu0 %v370_v0 }
  0x19   :  { %348 = vmatpush3.bf16.msra.mxu0 %v315_v35 }
  0x1a   :  { %349 = vmatprep.subr.bf16.mxu0 %v370_v0 }
  0x1d   :  { %350 = vmatpush3.bf16.msra.mxu0 %v316_v41 }
  0x1e   :  { %351 = vmatprep.subr.bf16.mxu0 %v370_v0 }
  0x21   :  { %352 = vmatpush3.bf16.msra.mxu0 %v317_v45 }
  0x24   :  { %354 = vmatmul.mubr.msk.bf16.vlgmr.msra.gmra.mrb[0].mxu0 %vm318_vm6, %v319_v47 }
  0xf7   :  { %v223_v51 = vpop.f32.mrb[0].mxu0 }
  0xf8   :  { %v229_v52 = vadd.f32 %v223_v51, %v139_v50  ;;  %v355_v53 = vpop.f32.mrb[1].mxu0 }
  0xf9   :  { %v226_v54 = vpop.f32.mrb[2].mxu0 }
  0xfa   :  { %231 = vst.msk [vmem:[#allocation2] sm:$0xff] %vm32_vm3, %v229_v52  ;;  %v356_v55 = vpop.f32.mrb[3].mxu0 }
 0x101   :  { %v235_v56 = vld [vmem:[#allocation2] sm:$0xff] }
 0x102   :  { %v236_v57 = vmax.f32 %v235_v56, 0.0 }
 0x104   :  { %v237_v58 = vpack.c.bf16 %v236_v57, %v236_v57 }
 0x106   :  { %362 = vmatmul.mubr.msk.bf16.vlgmr.msra.gmra.mrb[0].mxu1 %vm32_vm3, %v237_v58 }
 0x1d9   :  { %v298_v60 = vpop.f32.mrb[0].mxu1 }
 0x1da   :  { %v299_v61 = vadd.f32 %v321_v59, %v298_v60  ;;  %v363_v62 = vpop.f32.mrb[1].mxu1 }
 0x1db   :  { %v301_v63 = vpop.f32.mrb[2].mxu1 }
 0x1dc   :  { %304 = vst [vmem:[%s533_s5] sm:$0xff] %v299_v61  ;;  %v364_v0 = vpop.f32.mrb[3].mxu1 }

</bundles_post_ra>
